<compile_context>
chip_gen: v7x
topology: tpu7x:2x2x1
jax: 0.10.0
libtpu: 0.0.40
codegen_flags: <defaults>
</compile_context>

<pallas_src>
import functools

import jax
import jax.numpy as jnp
from jax import lax
from jax.experimental import pallas as pl
from jax.experimental.pallas import tpu as pltpu


def _round_up(x, m):
    return ((x + m - 1) // m) * m


def _cdiv(a, b):
    return (a + b - 1) // b


def _vmem_capacity_bytes():
    """Generation-aware VMEM capacity (v5e/v6e: 128 MiB, v7x: 64 MiB per core)."""
    try:
        cap = int(pltpu.get_tpu_info().vmem_capacity_bytes)
        if cap > 0:
            return cap
    except Exception:
        pass
    return 64 << 20  # conservative fallback: assume v7x's 64 MiB


def _make_conv_stats_kernel(tile_p, n_p, n_valid):
    """Conv tile on the MXU -> write y tile + centered partial stats.

    Stats per tile: (sum, sum of squared deviations from the tile mean), combined later
    with the parallel (Chan) variance formula -> numerically stable, no cross-iteration
    accumulator, so both grid axes stay 'parallel'.
    """
    p_pad = n_p * tile_p
    tail_cnt = n_valid - (n_p - 1) * tile_p  # in (0, tile_p]

    def kernel(pt_ref, wt_ref, y_ref, st_ref):
        # [C_out, K] @ [K, TILE_P] -> [C_out, TILE_P]  (bf16 inputs, f32 accumulation)
        y = jnp.dot(wt_ref[...], pt_ref[0], preferred_element_type=jnp.float32)
        y_ref[0] = y

        # padded tail columns of PT are zero -> y is zero there -> the sum needs no mask
        s = jnp.sum(y, axis=1, keepdims=True)              # (C_out, 1)

        def write_stats(cnt, mask_tail):
            mu = s * (1.0 / cnt)                           # tile-local mean
            d = y - mu
            if mask_tail:
                col = lax.broadcasted_iota(jnp.int32, y.shape, 1)
                d = jnp.where(col < cnt, d, 0.0)
            q = jnp.sum(d * d, axis=1, keepdims=True)      # centered sum of squares
            st_ref[...] = jnp.concatenate([s, q], axis=1)[None]   # (1, C_out, 2)

        if p_pad == n_valid:
            write_stats(tile_p, False)                     # no padded tail anywhere
        elif n_p == 1:
            write_stats(tail_cnt, True)                    # single (padded) tile
        else:
            p_idx = pl.program_id(1)

            @pl.when(p_idx < n_p - 1)
            def _():
                write_stats(tile_p, False)                 # interior tiles: unmasked fast path

            @pl.when(p_idx == n_p - 1)
            def _():
                write_stats(tail_cnt, True)                # only the tail tile pays the mask

    return kernel


def _bn_relu_kernel(y_ref, scale_ref, shift_ref, o_ref):
    # fused BN affine + ReLU; lane-dense store, overwrites y in place (aliased output)
    o_ref[...] = jnp.maximum(y_ref[...] * scale_ref[...] + shift_ref[...], 0.0)


@functools.partial(
    jax.jit,
    static_argnames=("stride", "padding", "eps", "tile_m", "compute_dtype"))
def conv_block_forward(x, w, b, gamma, beta, *, stride, padding, eps=1e-5,
                       tile_m=2048, compute_dtype=jnp.bfloat16):
    """x: NCHW float32. Returns NCHW float32 (Conv2d -> train-mode BatchNorm2d -> ReLU)."""
    # TODO(synk): deconv=True (ConvTranspose2d) and the 'sigmoid'/'leaky' activation
    # branches of the PyTorch module are not implemented (Conv2d + BN + ReLU path only).
    del b  # conv bias is exactly cancelled by train-mode BatchNorm.

    N, C_in, H, W = x.shape
    C_out, _, KH, KW = w.shape
    Ho = (H + 2 * padding - KH) // stride + 1
    Wo = (W + 2 * padding - KW) // stride + 1
    P = Ho * Wo                     # output pixels per image (lane dimension)
    K = KH * KW * C_in              # contraction depth

    itemsize = jnp.dtype(compute_dtype).itemsize

    # ---- tiling: lane-dense pixel tiles, sized from the chip's real VMEM budget ----
    cap = _vmem_capacity_bytes()
    # bytes of VMEM per lane of tile: double-buffered patch tile + f32 y tile (pass 1),
    # vs double-buffered y-in + out windows (pass 2)
    per_lane = max(2 * K * itemsize + 2 * C_out * 4, 4 * C_out * 4)
    budget = int(0.4 * cap)
    tile_cap = max(128, (budget // per_lane) // 128 * 128)

    tile_p = max(128, _round_up(int(tile_m), 128))
    tile_p = min(tile_p, tile_cap, _round_up(P, 128))
    n_p = _cdiv(P, tile_p)
    tile_p = _round_up(_cdiv(P, n_p), 128)          # rebalance to minimise the padded tail
    if N * n_p < 2 and P > 128:
        # keep >= 2 grid steps so v7x's two TensorCores both get work
        n_p = 2
        tile_p = _round_up(_cdiv(P, 2), 128)
    P_pad = n_p * tile_p

    vmem_limit = int(min(max(8 << 20, per_lane * tile_p + (2 << 20)), 0.5 * cap))
    cparams = pltpu.CompilerParams(
        dimension_semantics=("parallel", "parallel"),
        vmem_limit_bytes=vmem_limit)

    # ---- im2col (JAX side), laid out [N, K, P_pad]: pixels in lanes, K in sublanes ----
    # TODO(synk): move im2col into pass 1 to avoid the KH*KW-fold HBM duplication.
    x_nhwc = jnp.transpose(x, (0, 2, 3, 1))
    x_pad = jnp.pad(x_nhwc, ((0, 0), (padding, padding), (padding, padding), (0, 0)))
    cols = []
    for kh in range(KH):
        for kw in range(KW):
            cols.append(x_pad[:, kh:kh + stride * Ho:stride, kw:kw + stride * Wo:stride, :])
    patches = jnp.stack(cols, axis=0)                        # (KH*KW, N, Ho, Wo, C_in)
    PT = jnp.transpose(patches, (1, 0, 4, 2, 3)).reshape(N, K, P)
    if P_pad != P:
        PT = jnp.pad(PT, ((0, 0), (0, 0), (0, P_pad - P)))
    PT = PT.astype(compute_dtype)                            # bf16 MXU inputs, f32 accum
    WT = jnp.transpose(w, (0, 2, 3, 1)).reshape(C_out, K).astype(compute_dtype)

    # ---- pass 1: conv on the MXU -> y (NCHW-ordered, lane-dense) + per-tile stats ----
    y, stats = pl.pallas_call(
        _make_conv_stats_kernel(tile_p, n_p, P),
        out_shape=(
            jax.ShapeDtypeStruct((N, C_out, P_pad), jnp.float32),
            jax.ShapeDtypeStruct((N * n_p, C_out, 2), jnp.float32),
        ),
        grid_spec=pltpu.PrefetchScalarGridSpec(
            num_scalar_prefetch=0,
            grid=(N, n_p),
            in_specs=[
                pl.BlockSpec((1, K, tile_p), lambda n, p: (n, 0, p)),   # patch tile
                pl.BlockSpec((C_out, K), lambda n, p: (0, 0)),          # weights resident
            ],
            out_specs=(
                pl.BlockSpec((1, C_out, tile_p), lambda n, p: (n, 0, p)),
                pl.BlockSpec((1, C_out, 2), lambda n, p: (n * n_p + p, 0, 0)),
            ),
        ),
        compiler_params=cparams,
    )(PT, WT)

    # ---- combine per-tile centered partials (Chan): stable batch mean / biased var ----
    cnt_p = jnp.full((n_p,), float(tile_p), jnp.float32)
    cnt_p = cnt_p.at[n_p - 1].set(float(P - (n_p - 1) * tile_p))
    cnts = jnp.tile(cnt_p, (N,))[:, None]                    # (N*n_p, 1)
    s_part = stats[:, :, 0]                                  # (N*n_p, C_out)
    q_part = stats[:, :, 1]
    total = float(N * P)
    mean = jnp.sum(s_part, axis=0) / total                   # (C_out,)
    mean_t = s_part / cnts
    var = (jnp.sum(q_part, axis=0)
           + jnp.sum(cnts * (mean_t - mean[None, :]) ** 2, axis=0)) / total  # biased (BN)

    scale = (gamma.astype(jnp.float32) * lax.rsqrt(var + eps)).reshape(C_out, 1)
    shift = beta.astype(jnp.float32).reshape(C_out, 1) - mean.reshape(C_out, 1) * scale

    # ---- pass 2: fused BN affine + ReLU over y, overwriting y in place ----
    out_flat = pl.pallas_call(
        _bn_relu_kernel,
        out_shape=jax.ShapeDtypeStruct((N, C_out, P_pad), jnp.float32),
        grid_spec=pltpu.PrefetchScalarGridSpec(
            num_scalar_prefetch=0,
            grid=(N, n_p),
            in_specs=[
                pl.BlockSpec((1, C_out, tile_p), lambda n, p: (n, 0, p)),
                pl.BlockSpec((C_out, 1), lambda n, p: (0, 0)),
                pl.BlockSpec((C_out, 1), lambda n, p: (0, 0)),
            ],
            out_specs=pl.BlockSpec((1, C_out, tile_p), lambda n, p: (n, 0, p)),
        ),
        compiler_params=cparams,
        input_output_aliases={0: 0},                          # BN+ReLU overwrites y
    )(y, scale, shift)

    # already NCHW-ordered: drop padded tail lanes, split Ho*Wo -> no XLA transpose
    return out_flat[:, :, :P].reshape(N, C_out, Ho, Wo)


def _reference(x, w, b, gamma, beta, stride, padding, eps=1e-5):
    y = lax.conv_general_dilated(
        x, w, (stride, stride), ((padding, padding), (padding, padding)),
        dimension_numbers=("NCHW", "OIHW", "NCHW"))
    y = y + b[None, :, None, None]
    m = y.mean(axis=(0, 2, 3), keepdims=True)
    v = y.var(axis=(0, 2, 3), keepdims=True)      # biased variance (BN normalization)
    y = (y - m) * lax.rsqrt(v + eps) * gamma[None, :, None, None] + beta[None, :, None, None]
    return jnp.maximum(y, 0.0)


def _q(a):
    """Simulate the kernel's bf16 MXU-input quantisation for the strict check."""
    return a.astype(jnp.bfloat16).astype(jnp.float32)


if __name__ == "__main__":
    key = jax.random.PRNGKey(0)
    k1, k2, k3, k4, k5, k6 = jax.random.split(key, 6)

    # ConvBlock(in_channels=4, out_channels=8, kernel_size=3, stride=1, padding=1,
    #           activation='relu', deconv=False)
    N, C_in, H, W = 2, 4, 16, 16
    C_out, KH, KW = 8, 3, 3
    stride, padding = 1, 1

    x = jax.random.normal(k1, (N, C_in, H, W), jnp.float32)
    w = 0.1 * jax.random.normal(k2, (C_out, C_in, KH, KW), jnp.float32)
    b = 0.1 * jax.random.normal(k3, (C_out,), jnp.float32)
    gamma = 1.0 + 0.1 * jax.random.normal(k4, (C_out,), jnp.float32)
    beta = 0.1 * jax.random.normal(k5, (C_out,), jnp.float32)

    out = conv_block_forward(x, w, b, gamma, beta, stride=stride, padding=padding)
    out = jax.block_until_ready(out)
    assert out.shape == (N, C_out, H, W)
    # strict check: reference fed the same bf16-quantised conv inputs (isolates kernel math)
    ref_q = _reference(_q(x), _q(w), b, gamma, beta, stride, padding)
    assert jnp.allclose(out, ref_q, atol=1e-3, rtol=1e-3), float(jnp.max(jnp.abs(out - ref_q)))
    # fidelity check vs the full-f32 reference (bf16 MXU inputs -> ~1e-3..1e-2 level error)
    ref_f = _reference(x, w, b, gamma, beta, stride, padding)
    assert jnp.allclose(out, ref_f, atol=5e-2, rtol=5e-2), float(jnp.max(jnp.abs(out - ref_f)))

    # second shape: odd spatial size -> padded-tail masking + multi-tile stat combine,
    # exercised on the full-f32 compute path (strict tolerance)
    N2, C2, H2, W2 = 1, 3, 15, 15
    x2 = jax.random.normal(k6, (N2, C2, H2, W2), jnp.float32)
    w2 = 0.1 * jax.random.normal(k2, (C_out, C2, KH, KW), jnp.float32)
    out2 = conv_block_forward(x2, w2, b, gamma, beta, stride=1, padding=1,
                              tile_m=128, compute_dtype=jnp.float32)
    out2 = jax.block_until_ready(out2)
    ref2 = _reference(x2, w2, b, gamma, beta, 1, 1)
    assert out2.shape == ref2.shape == (N2, C_out, H2, W2)
    assert jnp.allclose(out2, ref2, atol=1e-4, rtol=1e-4), float(jnp.max(jnp.abs(out2 - ref2)))

    print("KERNEL_OK")
</pallas_src>

<mosaic_0001>
module attributes {stable_mosaic.version = 11 : i64} {
  func.func @_bn_relu_kernel(%arg0: i32, %arg1: i32, %arg2: memref<1x8x256xf32, #tpu.memory_space<vmem>>, %arg3: memref<8x1xf32, #tpu.memory_space<vmem>>, %arg4: memref<8x1xf32, #tpu.memory_space<vmem>>, %arg5: memref<1x8x256xf32, #tpu.memory_space<vmem>>) attributes {dimension_semantics = [#tpu.dimension_semantics<parallel>, #tpu.dimension_semantics<parallel>], iteration_bounds = array<i64: 2, 1>, scalar_prefetch = 0 : i64, scratch_operands = 0 : i64, tpu.core_type = #tpu.core_type<tc>, window_params = [{transform_indices = @transform_0, window_bounds = array<i64: 1, 8, 256>}, {pipeline_mode = #tpu.pipeline_mode<synchronous>, transform_indices = @transform_1, window_bounds = array<i64: 8, 1>}, {pipeline_mode = #tpu.pipeline_mode<synchronous>, transform_indices = @transform_2, window_bounds = array<i64: 8, 1>}, {transform_indices = @transform_3, window_bounds = array<i64: 1, 8, 256>}]} {
    %c0 = arith.constant 0 : index
    %c0_0 = arith.constant 0 : index
    %c0_1 = arith.constant 0 : index
    %0 = vector.load %arg2[%c0, %c0_0, %c0_1] : memref<1x8x256xf32, #tpu.memory_space<vmem>>, vector<1x8x256xf32>
    %c0_2 = arith.constant 0 : index
    %c0_3 = arith.constant 0 : index
    %1 = vector.load %arg3[%c0_2, %c0_3] : memref<8x1xf32, #tpu.memory_space<vmem>>, vector<8x1xf32>
    %2 = vector.shape_cast %1 : vector<8x1xf32> to vector<1x8x1xf32>
    %3 = vector.broadcast %2 : vector<1x8x1xf32> to vector<1x8x256xf32>
    %4 = arith.mulf %0, %3 : vector<1x8x256xf32>
    %c0_4 = arith.constant 0 : index
    %c0_5 = arith.constant 0 : index
    %5 = vector.load %arg4[%c0_4, %c0_5] : memref<8x1xf32, #tpu.memory_space<vmem>>, vector<8x1xf32>
    %6 = vector.shape_cast %5 : vector<8x1xf32> to vector<1x8x1xf32>
    %7 = vector.broadcast %6 : vector<1x8x1xf32> to vector<1x8x256xf32>
    %8 = arith.addf %4, %7 : vector<1x8x256xf32>
    %cst = arith.constant 0.000000e+00 : f32
    %9 = vector.broadcast %cst : f32 to vector<1x8x256xf32>
    %10 = arith.maximumf %8, %9 : vector<1x8x256xf32>
    %c0_6 = arith.constant 0 : index
    %c0_7 = arith.constant 0 : index
    %c0_8 = arith.constant 0 : index
    %11 = vector.load %arg5[%c0_6, %c0_7, %c0_8] : memref<1x8x256xf32, #tpu.memory_space<vmem>>, vector<1x8x256xf32>
    tpu.vector_store %arg5[%c0_6, %c0_7, %c0_8], %10 {strides = array<i32>} : memref<1x8x256xf32, #tpu.memory_space<vmem>>, vector<1x8x256xf32>,
    return
  }
  func.func @transform_0(%arg0: i32, %arg1: i32) -> (i32, i32, i32) {
    %c0_i32 = arith.constant 0 : i32
    %c0_i32_0 = arith.constant 0 : i32
    return %arg0, %c0_i32, %arg1 : i32, i32, i32
  }
  func.func @transform_1(%arg0: i32, %arg1: i32) -> (i32, i32) {
    %c0_i32 = arith.constant 0 : i32
    %c0_i32_0 = arith.constant 0 : i32
    %c0_i32_1 = arith.constant 0 : i32
    return %c0_i32, %c0_i32_0 : i32, i32
  }
  func.func @transform_2(%arg0: i32, %arg1: i32) -> (i32, i32) {
    %c0_i32 = arith.constant 0 : i32
    %c0_i32_0 = arith.constant 0 : i32
    %c0_i32_1 = arith.constant 0 : i32
    return %c0_i32, %c0_i32_0 : i32, i32
  }
  func.func @transform_3(%arg0: i32, %arg1: i32) -> (i32, i32, i32) {
    %c0_i32 = arith.constant 0 : i32
    %c0_i32_0 = arith.constant 0 : i32
    return %arg0, %c0_i32, %arg1 : i32, i32, i32
  }
}

module attributes {stable_mosaic.version = 11 : i64} {
  func.func @kernel(%arg0: i32, %arg1: i32, %arg2: memref<1x36x256xbf16, #tpu.memory_space<vmem>>, %arg3: memref<8x36xbf16, #tpu.memory_space<vmem>>, %arg4: memref<1x8x256xf32, #tpu.memory_space<vmem>>, %arg5: memref<1x8x2xf32, #tpu.memory_space<vmem>>) attributes {dimension_semantics = [#tpu.dimension_semantics<parallel>, #tpu.dimension_semantics<parallel>], iteration_bounds = array<i64: 2, 1>, scalar_prefetch = 0 : i64, scratch_operands = 0 : i64, tpu.core_type = #tpu.core_type<tc>, window_params = [{transform_indices = @transform_0, window_bounds = array<i64: 1, 36, 256>}, {pipeline_mode = #tpu.pipeline_mode<synchronous>, transform_indices = @transform_1, window_bounds = array<i64: 8, 36>}, {transform_indices = @transform_2, window_bounds = array<i64: 1, 8, 256>}, {transform_indices = @transform_3, window_bounds = array<i64: 1, 8, 2>}]} {
    %c0 = arith.constant 0 : index
    %c0_0 = arith.constant 0 : index
    %0 = vector.load %arg3[%c0, %c0_0] : memref<8x36xbf16, #tpu.memory_space<vmem>>, vector<8x36xbf16>
    %c0_1 = arith.constant 0 : index
    %c0_2 = arith.constant 0 : index
    %c0_3 = arith.constant 0 : index
    %1 = vector.load %arg2[%c0_1, %c0_2, %c0_3] : memref<1x36x256xbf16, #tpu.memory_space<vmem>>, vector<1x36x256xbf16>
    %2 = vector.shape_cast %1 : vector<1x36x256xbf16> to vector<36x256xbf16>
    %cst = arith.constant dense<0.000000e+00> : vector<8x256xf32>
    %3 = tpu.matmul %0, %2, %cst {dimension_numbers = #tpu.dot_dimension_numbers<[1], [0], [0], [1], [0, 0, 1, 1], [], []>} : vector<8x36xbf16>, vector<36x256xbf16>, vector<8x256xf32> -> vector<8x256xf32>
    %c0_4 = arith.constant 0 : index
    %c0_5 = arith.constant 0 : index
    %c0_6 = arith.constant 0 : index
    %4 = vector.load %arg4[%c0_4, %c0_5, %c0_6] : memref<1x8x256xf32, #tpu.memory_space<vmem>>, vector<1x8x256xf32>
    %5 = vector.shape_cast %4 : vector<1x8x256xf32> to vector<8x256xf32>
    %6 = vector.shape_cast %3 : vector<8x256xf32> to vector<1x8x256xf32>
    tpu.vector_store %arg4[%c0_4, %c0_5, %c0_6], %6 {strides = array<i32>} : memref<1x8x256xf32, #tpu.memory_space<vmem>>, vector<1x8x256xf32>,
    %cst_7 = arith.constant dense<0.000000e+00> : vector<8xf32>
    %7 = vector.multi_reduction <add>, %3, %cst_7 [1] : vector<8x256xf32> to vector<8xf32>
    %8 = vector.shape_cast %7 : vector<8xf32> to vector<8x1xf32>
    %cst_8 = arith.constant 3.906250e-03 : f32
    %9 = vector.broadcast %cst_8 : f32 to vector<8x1xf32>
    %10 = arith.mulf %8, %9 : vector<8x1xf32>
    %11 = vector.broadcast %10 : vector<8x1xf32> to vector<8x256xf32>
    %12 = arith.subf %3, %11 : vector<8x256xf32>
    %13 = arith.mulf %12, %12 : vector<8x256xf32>
    %cst_9 = arith.constant dense<0.000000e+00> : vector<8xf32>
    %14 = vector.multi_reduction <add>, %13, %cst_9 [1] : vector<8x256xf32> to vector<8xf32>
    %15 = vector.shape_cast %14 : vector<8xf32> to vector<8x1xf32>
    %16 = tpu.concatenate %8, %15 in 1 : vector<8x1xf32>, vector<8x1xf32> -> vector<8x2xf32>
    %17 = vector.shape_cast %16 : vector<8x2xf32> to vector<1x8x2xf32>
    %c0_10 = arith.constant 0 : index
    %c0_11 = arith.constant 0 : index
    %c0_12 = arith.constant 0 : index
    %18 = vector.load %arg5[%c0_10, %c0_11, %c0_12] : memref<1x8x2xf32, #tpu.memory_space<vmem>>, vector<1x8x2xf32>
    tpu.vector_store %arg5[%c0_10, %c0_11, %c0_12], %17 {strides = array<i32>} : memref<1x8x2xf32, #tpu.memory_space<vmem>>, vector<1x8x2xf32>,
    return
  }
  func.func @transform_0(%arg0: i32, %arg1: i32) -> (i32, i32, i32) {
    %c0_i32 = arith.constant 0 : i32
    %c0_i32_0 = arith.constant 0 : i32
    return %arg0, %c0_i32, %arg1 : i32, i32, i32
  }
  func.func @transform_1(%arg0: i32, %arg1: i32) -> (i32, i32) {
    %c0_i32 = arith.constant 0 : i32
    %c0_i32_0 = arith.constant 0 : i32
    %c0_i32_1 = arith.constant 0 : i32
    return %c0_i32, %c0_i32_0 : i32, i32
  }
  func.func @transform_2(%arg0: i32, %arg1: i32) -> (i32, i32, i32) {
    %c0_i32 = arith.constant 0 : i32
    %c0_i32_0 = arith.constant 0 : i32
    return %arg0, %c0_i32, %arg1 : i32, i32, i32
  }
  func.func @transform_3(%arg0: i32, %arg1: i32) -> (i32, i32, i32) {
    %c1_i32 = arith.constant 1 : i32
    %0 = arith.muli %arg0, %c1_i32 : i32
    %1 = arith.addi %0, %arg1 : i32
    %c0_i32 = arith.constant 0 : i32
    %c0_i32_0 = arith.constant 0 : i32
    %c0_i32_1 = arith.constant 0 : i32
    return %1, %c0_i32, %c0_i32_0 : i32, i32, i32
  }
}

</mosaic_0001>

<bundles_post_ra>
// kernel: conv_block_forward.3
= control target key start
LH: loop header
LB: loop body
LE: loop exit
PB: predicated region body
PF: predicated region fallthrough
CT: control target
= control target key end

     0   :  { %s403_s12 = smov 0   ;;  %s405_s13 = smov 0   ;;  %s442_s0 = inlined_call_operand.vmem [shape: f32[2,8,256], index: 0, kind: input, shape index: {}, may-alias: {0,3}]   ;;  %s443_s1 = inlined_call_operand.vmem [shape: f32[8,1], index: 1, kind: input, shape index: {}]   ;;  %s444_s2 = inlined_call_operand.vmem [shape: f32[8,1], index: 2, kind: input, shape index: {}]   ;;  %s445_s3 = inlined_call_operand.vmem [shape: f32[2,8,256], index: 3, kind: output, shape index: {}, may-alias: {0,3}]  }
   0x1   :  { %s407_s14 = smov 0  }
   0x2 LB: > { %s25_s15 = sadd.s32 1, %s376_s13  ;;  %p323_p0 = scmp.ge.s32.totalorder %s380_s14, 1  ;;  %s380_s14 = sphi %s407_s14, %s13_s14   ;;  %s376_s13 = sphi %s405_s13, %s447_s13   ;;  %s372_s12 = sphi %s403_s12, %s446_s12  }
   0x3   : > { %p27_p1 = scmp.ge.s32.totalorder %s25_s15, 2  ;;  %p158_p2 = scmp.lt.s32.totalorder %s380_s14, 3 }
   0x5   : > { %s449_s15 = smov (%p27_p1, %s25_s15), 0  ;;  %p159_p3 = pnand %p323_p0, %p158_p2 }
   0x6   : > { %v212_v0 = vld [vmem:[%s443_s1] sm:$0xff] (!%p159_p3)  ;;  %v382_v1 = vmov (!%p159_p3), 0   ;;  %p191_p4 = scmp.lt.s32.totalorder (!%p159_p3), %s372_s12, 1 }
   0x7   : > { %162 = sbr.rel (%p159_p3) target bundleno = 145 (0x91), region = 32  ;;  %357 = vset.pattern.permute.xlu0 (!%p159_p3), %v382_v1  ;;  %v220_v2 = vld [vmem:[%s444_s2] sm:$0xff] (!%p159_p3) }
   0x8   : > { %215 = vperm.xlu0 (!%p159_p3), %357, %v212_v0  }
   0xc   : > { %223 = vperm.xlu0 (!%p159_p3), %357, %v220_v2  }
   0xe   : > { %s451_s12 = smov (!%p191_p4, %s372_s12), 1 }
   0xf   : > { %s330_s20 = sshll.u32 %s451_s12, 4 }
  0x10   : > { %s198_s23 = scalar_lea.vmem %s442_s0, %s330_s20  ;;  %s208_s26 = scalar_lea.vmem %s445_s3, %s330_s20 }
  0x11   : > { %v210_v4 = vld [vmem:[%s198_s23] sm:$0xff]  ;;  %v211_v5 = vld [vmem:[%s198_s23 + $0x8] sm:$0xff] }
  0x87   : > { %v216_v3 = vpop.permute.xlu0 %215 }
  0x88   : > { %v218_v6 = vmul.f32 %v216_v3, %v210_v4  ;;  %v219_v7 = vmul.f32 %v216_v3, %v211_v5 }
  0x8b   : > { %v224_v8 = vpop.permute.xlu0 %223 }
  0x8c   : > { %v226_v9 = vadd.f32 %v224_v8, %v218_v6  ;;  %v227_v10 = vadd.f32 %v224_v8, %v219_v7 }
  0x8e   : > { %v228_v11 = vmax.f32 %v226_v9, 0.0  ;;  %v229_v12 = vmax.f32 %v227_v10, 0.0 }
  0x90   : > { %230 = vst [vmem:[%s208_s26] sm:$0xff] %v228_v11  ;;  %231 = vst [vmem:[%s208_s26 + $0x8] sm:$0xff] %v229_v12 }
  0x91 PF: > { %s13_s14 = sadd.s32 1, %s380_s14   ;;  %s446_s12 = smov %s376_s13 }
  0x92   : > { %p10_p5 = scmp.ge.s32.totalorder %s13_s14, 4   ;;  %s447_s13 = smov %s449_s15 }
  0x94   :  { %12 = sbr.rel (!%p10_p5) target bundleno = 2 (0x2), region = 62 }

// kernel: conv_block_forward.2
= control target key start
LH: loop header
LB: loop body
LE: loop exit
PB: predicated region body
PF: predicated region fallthrough
CT: control target
= control target key end

     0   :  { %s547_s12 = smov 0   ;;  %s549_s13 = smov 0   ;;  %s591_s0 = inlined_call_operand.vmem [shape: bf16[2,36,256], index: 0, kind: input, shape index: {}]   ;;  %s592_s1 = inlined_call_operand.vmem [shape: bf16[8,36], index: 1, kind: input, shape index: {}]   ;;  %s593_s2 = inlined_call_operand.vmem [shape: f32[2,8,256], index: 2, kind: output, shape index: {0}]   ;;  %s594_s3 = inlined_call_operand.vmem [shape: f32[2,8,2], index: 3, kind: output, shape index: {1}]  }
   0x1   :  { %s551_s14 = smov 0  }
   0x2 LB: > { %s26_s15 = sadd.s32 1, %s520_s13  ;;  %p452_p0 = scmp.ge.s32.totalorder %s524_s14, 1  ;;  %s524_s14 = sphi %s551_s14, %s14_s14   ;;  %s520_s13 = sphi %s549_s13, %s596_s13   ;;  %s516_s12 = sphi %s547_s12, %s595_s12  }
   0x3   : > { %p28_p1 = scmp.ge.s32.totalorder %s26_s15, 2  ;;  %p163_p2 = scmp.lt.s32.totalorder %s524_s14, 3 }
   0x5   : > { %s598_s15 = smov (%p28_p1, %s26_s15), 0  ;;  %p164_p3 = pnand %p452_p0, %p163_p2 }
   0x6   : > { %p201_p4 = scmp.lt.s32.totalorder (!%p164_p3), %s516_s12, 1  ;;  %v526_v0 = vmov (!%p164_p3), 0   ;;  %vm262_vm0 = vcmask (!%p164_p3), 1041408   ;;  %v227_v9 = vld [vmem:[%s592_s1] sm:$0xf] (!%p164_p3)  ;;  %vm258_vm1 = vcmask (!%p164_p3), 293888  }
   0x7   : > { %167 = sbr.rel (%p164_p3) target bundleno = 540 (0x21c), region = 28  ;;  %301 = vmatprep.mubr.bf16.mxu0 (!%p164_p3), %v526_v0  ;;  %vm323_vm2 = vcmask (!%p164_p3), 7168   ;;  %vm325_vm3 = vcmask (!%p164_p3), 15360  }
   0xe   : > { %s600_s12 = smov (!%p201_p4, %s516_s12), 1 }
   0xf   : > { %s468_s16 = smul.u32 40, %s600_s12  ;;  %s467_s22 = sshll.u32 %s600_s12, 4 }
  0x10   : > { %s218_s25 = scalar_lea.vmem %s593_s2, %s467_s22  ;;  %s456_s26 = sshll.u32 %s600_s12, 3 }
  0x11   : > { %s208_s19 = scalar_lea.vmem %s591_s0, %s468_s16  ;;  %s224_s29 = scalar_lea.vmem %s594_s3, %s456_s26 }
  0x12   : > { %v494_v1 = vld [vmem:[%s208_s19 + $0x4] ss:$8 sps:$4 sm:$0xff]   ;;  %v496_v2 = vld [vmem:[%s208_s19] ss:$8 sps:$4 sm:$0xff]   ;;  %v497_v3 = vld [vmem:[%s208_s19 + $0x14] ss:$8 sps:$4 sm:$0xff]  }
  0x13   : > { %269 = vmatprep.subr.bf16.mxu0 %v494_v1  ;;  %v232_v4 = vld [vmem:[%s208_s19 + $0x20] sm:$0x33]  ;;  %v499_v5 = vld [vmem:[%s208_s19 + $0x10] ss:$8 sps:$4 sm:$0xff]  }
  0x14   : > { %270 = vmatpush1.bf16.msra.mxu0 %v496_v2  ;;  %v462_v6 = vcombine.high %v232_v4, %v232_v4  ;;  %v461_v7 = vcombine.low %v232_v4, %v232_v4 }
  0x15   : > { %271 = vmatprep.subr.bf16.mxu0 %v497_v3 }
  0x16   : > { %v264_v8 = vsel %vm262_vm0, %v461_v7, 0 }
  0x18   : > { %272 = vmatpush1.bf16.msra.mxu0 %v499_v5 }
  0x19   : > { %463 = vmatprep.subr.msk.bf16.mxu0 %vm262_vm0, %v462_v6 }
  0x1c   : > { %274 = vmatpush1.bf16.msra.mxu0 %v264_v8 }
  0x1f   : > { %464 = vmatmul.mubr.msk.bf16.vlgmr.msra.gmra.mrb[0].mxu0 %vm258_vm1, %v227_v9 }
  0xf2   : > { %v303_v10 = vpop.f32.mrb[0].mxu0 }
  0xf3   : > { %310 = vst [vmem:[%s218_s25] sm:$0xff] %v303_v10  ;;  %v305_v11 = vpop.f32.mrb[1].mxu0 }
  0xf4   : > { %311 = vst [vmem:[%s218_s25 + $0x8] sm:$0xff] %v305_v11  ;;  %v307_v12 = vpop.f32.mrb[2].mxu0  ;;  %v312_v13 = vadd.f32 %v305_v11, %v303_v10 }
  0xf5   : > { %v308_v14 = vpop.f32.mrb[3].mxu0 }
  0xf6   : > { %313 = vadd.xlane.f32.xlu0 %v312_v13 }
 0x183   : > { %v314_v15 = vpop.xlane.xlu0 %313 }
 0x184   : > { %v315_v16 = vmul.f32 0.00390625, %v314_v15 }
 0x186   : > { %v316_v17 = vsub.f32 %v303_v10, %v315_v16  ;;  %v317_v18 = vsub.f32 %v305_v11, %v315_v16 }
 0x188   : > { %v318_v19 = vmul.f32 %v316_v17, %v316_v17  ;;  %v319_v20 = vmul.f32 %v317_v18, %v317_v18 }
 0x18a   : > { %v320_v21 = vadd.f32 %v319_v20, %v318_v19 }
 0x18c   : > { %321 = vadd.xlane.f32.xlu0 %v320_v21 }
 0x219   : > { %v322_v22 = vpop.xlane.xlu0 %321 }
 0x21a   : > { %v324_v23 = vsel %vm323_vm2, %v314_v15, %v322_v22 }
 0x21b   : > { %326 = vst.msk [vmem:[%s224_s29] sm:$0xff] %vm325_vm3, %v324_v23 }
 0x21c PF: > { %s14_s14 = sadd.s32 1, %s524_s14   ;;  %s595_s12 = smov %s520_s13 }
 0x21d   : > { %p11_p5 = scmp.ge.s32.totalorder %s14_s14, 4   ;;  %s596_s13 = smov %s598_s15 }
 0x21f   :  { %13 = sbr.rel (!%p11_p5) target bundleno = 2 (0x2), region = 70 }

</bundles_post_ra>
